<compile_context>
chip_gen: v7x
topology: tpu7x:2x2x1
jax: 0.10.0
libtpu: 0.0.40
codegen_flags: <defaults>
</compile_context>

<pallas_src>
import functools

import jax
import jax.numpy as jnp
from jax.experimental import pallas as pl
from jax.experimental.pallas import tpu as pltpu

BN_EPS = 1e-5
# Set to jnp.bfloat16 on v6e / v7x to run the MXU at full bf16 rate (BN stats
# and accumulation stay f32); kept f32 here so the tight self-test tolerance
# holds bit-for-bit against the f32 reference.
MATMUL_DTYPE = jnp.float32

_ROLL_MODE = None  # ("roll", <matches np.roll?>) or ("concat", None)


def _detect_roll_mode():
    """Probe pltpu.roll once on-device: does it follow np.roll semantics
    (out[i] = in[i - shift])?  Falls back to a concatenate-based shift if the
    roll lowering is unavailable for this rank/shape."""
    global _ROLL_MODE
    if _ROLL_MODE is not None:
        return _ROLL_MODE
    try:
        def probe(o_ref):
            lane = jax.lax.broadcasted_iota(jnp.int32, (2, 8, 128), 2)
            o_ref[...] = pltpu.roll(lane, 1, 2)

        r = jax.block_until_ready(
            pl.pallas_call(
                probe,
                out_shape=jax.ShapeDtypeStruct((2, 8, 128), jnp.int32),
            )()
        )
        v = int(r[0, 0, 0])
        if v == 127:        # out[0] == in[-1] -> np.roll convention
            _ROLL_MODE = ("roll", True)
        elif v == 1:        # out[0] == in[+1] -> reversed convention
            _ROLL_MODE = ("roll", False)
        else:               # unexpected -> safe fallback
            _ROLL_MODE = ("concat", None)
    except Exception:
        _ROLL_MODE = ("concat", None)
    return _ROLL_MODE


def _double_conv_kernel(x_ref, w1_ref, w2_ref, g1_ref, b1_ref, g2_ref, b2_ref,
                        gb_ref, bb_ref, o_ref, *, mid_ch, use_roll,
                        roll_is_numpy):
    # x_ref : (B, Cin, L)             activations, NCL (PyTorch layout)
    # w1_ref: (3*Mid + Cout, Cin)     conv1 taps [w(:,:,0); w(:,:,1); w(:,:,2)] + 1x1 bypass
    # w2_ref: (3*Cout, Mid)           conv2 taps
    # g*/b*_ref: (1, C, 1)            BatchNorm gamma / beta
    # o_ref : (B, Cout, L)
    B, Cin, L = x_ref.shape
    Cout = o_ref.shape[1]
    Mid = mid_ch
    inv_n = 1.0 / float(B * L)

    lane = jax.lax.broadcasted_iota(jnp.int32, (1, 1, L), 2)

    def shift_prev(t):
        # out[..., l] = t[..., l-1], zero at l == 0 ('same' conv left halo).
        if use_roll:
            r = pltpu.roll(t, 1 if roll_is_numpy else L - 1, 2)
            return jnp.where(lane > 0, r, 0.0)
        z = jnp.zeros(t.shape[:2] + (1,), t.dtype)
        return jnp.concatenate([z, t[:, :, :L - 1]], axis=2)

    def shift_next(t):
        # out[..., l] = t[..., l+1], zero at l == L-1 (right halo).
        if use_roll:
            r = pltpu.roll(t, L - 1 if roll_is_numpy else 1, 2)
            return jnp.where(lane < L - 1, r, 0.0)
        z = jnp.zeros(t.shape[:2] + (1,), t.dtype)
        return jnp.concatenate([t[:, :, 1:], z], axis=2)

    def batched_matmul(w2d, h):
        # (Nout, K) x (B, K, L) -> (B, Nout, L), f32 accumulation on the MXU.
        wb = jnp.broadcast_to(w2d[None], (B,) + w2d.shape)
        return jax.lax.dot_general(
            wb, h,
            dimension_numbers=(((2,), (1,)), ((0,), (0,))),
            preferred_element_type=jnp.float32)

    def batchnorm(h, g_ref, b_ref):
        # PyTorch BatchNorm1d training mode: per-channel stats over (B, L),
        # biased variance, eps=1e-5; single pass, folded to one scale+shift.
        s1 = jnp.sum(jnp.sum(h, axis=2, keepdims=True), axis=0, keepdims=True)
        s2 = jnp.sum(jnp.sum(h * h, axis=2, keepdims=True), axis=0,
                     keepdims=True)
        mean = s1 * inv_n
        var = s2 * inv_n - mean * mean
        scale = g_ref[...] * jax.lax.rsqrt(var + BN_EPS)     # (1, C, 1)
        shift = b_ref[...] - mean * scale                    # (1, C, 1)
        return h * scale + shift

    x = x_ref[...].astype(MATMUL_DTYPE)
    w1 = w1_ref[...].astype(MATMUL_DTYPE)
    w2 = w2_ref[...].astype(MATMUL_DTYPE)

    # ---- conv1 (k=3, pad=1) + 1x1 bypass: ONE fused MXU dot ---------------
    t1 = batched_matmul(w1, x)                        # (B, 3*Mid + Cout, L)
    h = (t1[:, Mid:2 * Mid, :]
         + shift_prev(t1[:, 0:Mid, :])
         + shift_next(t1[:, 2 * Mid:3 * Mid, :]))
    yb = t1[:, 3 * Mid:, :]                           # 1x1 bypass, pre-BN

    # ---- BN -> ReLU --------------------------------------------------------
    h = jnp.maximum(batchnorm(h, g1_ref, b1_ref), 0.0)

    # ---- conv2 (k=3, pad=1): ONE fused MXU dot -----------------------------
    t2 = batched_matmul(w2, h.astype(MATMUL_DTYPE))   # (B, 3*Cout, L)
    y = (t2[:, Cout:2 * Cout, :]
         + shift_prev(t2[:, 0:Cout, :])
         + shift_next(t2[:, 2 * Cout:3 * Cout, :]))

    # ---- BN on both branches, residual add, final ReLU ---------------------
    y = batchnorm(y, g2_ref, b2_ref)
    yb = batchnorm(yb, gb_ref, bb_ref)
    o_ref[...] = jnp.maximum(y + yb, 0.0).astype(o_ref.dtype)


def double_conv_forward(x_ncl, params):
    """x_ncl: (B, Cin, L) float32 (PyTorch NCL). Returns (B, Cout, L)."""
    w1cat, w2cat, g1, b1, g2, b2, gb, bb = params
    B, Cin, L = x_ncl.shape
    Mid = w2cat.shape[1]
    Cout = w2cat.shape[0] // 3

    mode, roll_is_numpy = _detect_roll_mode()
    kernel = functools.partial(
        _double_conv_kernel, mid_ch=Mid,
        use_roll=(mode == "roll"), roll_is_numpy=bool(roll_is_numpy))

    vmem = pl.BlockSpec(memory_space=pltpu.MemorySpace.VMEM)
    return pl.pallas_call(
        kernel,
        out_shape=jax.ShapeDtypeStruct((B, Cout, L), jnp.float32),
        in_specs=[vmem] * 9,
        out_specs=vmem,
        compiler_params=pltpu.CompilerParams(
            vmem_limit_bytes=32 * 1024 * 1024),
    )(x_ncl.astype(jnp.float32), w1cat, w2cat, g1, b1, g2, b2, gb, bb)


def init_params(key, in_ch, out_ch, mid_ch=None):
    """Matches DoubleConv.__init__: conv weights ~ N(0, 0.02), conv bias = 0
    (dropped - exactly cancelled by the following training-mode BatchNorm),
    BatchNorm gamma = 1 / beta = 0."""
    if mid_ch is None:
        mid_ch = out_ch
    k1, k2, k3 = jax.random.split(key, 3)
    # PyTorch Conv1d weight layout: (out_channels, in_channels, kernel).
    w1_oik = 0.02 * jax.random.normal(k1, (mid_ch, in_ch, 3), jnp.float32)
    w2_oik = 0.02 * jax.random.normal(k2, (out_ch, mid_ch, 3), jnp.float32)
    wb_oik = 0.02 * jax.random.normal(k3, (out_ch, in_ch, 1), jnp.float32)
    # Fused kernel layouts: all 3 taps (and, for conv1, the 1x1 bypass)
    # stacked along the output-channel axis -> one MXU dot per conv stage.
    w1cat = jnp.concatenate(
        [w1_oik[:, :, 0], w1_oik[:, :, 1], w1_oik[:, :, 2], wb_oik[:, :, 0]],
        axis=0)                                      # (3*Mid + Cout, Cin)
    w2cat = jnp.concatenate(
        [w2_oik[:, :, 0], w2_oik[:, :, 1], w2_oik[:, :, 2]], axis=0)  # (3*Cout, Mid)
    ones = lambda c: jnp.ones((1, c, 1), jnp.float32)
    zeros = lambda c: jnp.zeros((1, c, 1), jnp.float32)
    params = (w1cat, w2cat, ones(mid_ch), zeros(mid_ch),
              ones(out_ch), zeros(out_ch), ones(out_ch), zeros(out_ch))
    return params, (w1_oik, w2_oik, wb_oik)


def _ref_forward(x, oik_weights):
    """Pure-JAX reference replicating the PyTorch forward
    (bias=0, gamma=1, beta=0, training-mode BatchNorm)."""
    w1, w2, wb = oik_weights

    def conv(h, w, pad):
        return jax.lax.conv_general_dilated(
            h, w, window_strides=(1,), padding=[(pad, pad)],
            dimension_numbers=('NCH', 'OIH', 'NCH'))

    def bn(h):
        mean = jnp.mean(h, axis=(0, 2), keepdims=True)
        var = jnp.mean((h - mean) ** 2, axis=(0, 2), keepdims=True)
        return (h - mean) / jnp.sqrt(var + BN_EPS)

    h = jax.nn.relu(bn(conv(x, w1, 1)))
    y = bn(conv(h, w2, 1))
    yb = bn(conv(x, wb, 0))
    return jax.nn.relu(y + yb)


if __name__ == "__main__":
    key = jax.random.PRNGKey(0)
    kx, kp = jax.random.split(key)
    B, Cin, Cout, L = 2, 4, 8, 16
    x = jax.random.normal(kx, (B, Cin, L), jnp.float32)
    params, oik = init_params(kp, Cin, Cout)

    out = jax.block_until_ready(double_conv_forward(x, params))
    assert out.shape == (B, Cout, L)

    ref = _ref_forward(x, oik)
    max_err = float(jnp.max(jnp.abs(out - ref)))
    assert max_err < 1e-3, f"max abs err vs reference: {max_err}"
    print("KERNEL_OK")
</pallas_src>

<mosaic_0001>
module attributes {stable_mosaic.version = 11 : i64} {
  func.func @_double_conv_kernel(%arg0: memref<2x4x16xf32, #tpu.memory_space<vmem>>, %arg1: memref<32x4xf32, #tpu.memory_space<vmem>>, %arg2: memref<24x8xf32, #tpu.memory_space<vmem>>, %arg3: memref<1x8x1xf32, #tpu.memory_space<vmem>>, %arg4: memref<1x8x1xf32, #tpu.memory_space<vmem>>, %arg5: memref<1x8x1xf32, #tpu.memory_space<vmem>>, %arg6: memref<1x8x1xf32, #tpu.memory_space<vmem>>, %arg7: memref<1x8x1xf32, #tpu.memory_space<vmem>>, %arg8: memref<1x8x1xf32, #tpu.memory_space<vmem>>, %arg9: memref<2x8x16xf32, #tpu.memory_space<vmem>>) attributes {dimension_semantics = [], scalar_prefetch = 0 : i64, scratch_operands = 0 : i64, tpu.core_type = #tpu.core_type<tc>} {
    %c0 = arith.constant 0 : index
    %c0_0 = arith.constant 0 : index
    %c0_1 = arith.constant 0 : index
    %0 = vector.load %arg0[%c0, %c0_0, %c0_1] : memref<2x4x16xf32, #tpu.memory_space<vmem>>, vector<2x4x16xf32>
    %c0_2 = arith.constant 0 : index
    %c0_3 = arith.constant 0 : index
    %1 = vector.load %arg1[%c0_2, %c0_3] : memref<32x4xf32, #tpu.memory_space<vmem>>, vector<32x4xf32>
    %c0_4 = arith.constant 0 : index
    %c0_5 = arith.constant 0 : index
    %2 = vector.load %arg2[%c0_4, %c0_5] : memref<24x8xf32, #tpu.memory_space<vmem>>, vector<24x8xf32>
    %3 = vector.shape_cast %1 : vector<32x4xf32> to vector<1x32x4xf32>
    %4 = vector.shape_cast %3 : vector<1x32x4xf32> to vector<1x32x4xf32>
    %5 = vector.broadcast %4 : vector<1x32x4xf32> to vector<2x32x4xf32>
    %cst = arith.constant dense<0.000000e+00> : vector<2x32x16xf32>
    %6 = tpu.matmul %5, %0, %cst {dimension_numbers = #tpu.dot_dimension_numbers<[2], [1], [1], [2], [0, 0, 0, 1, 1, 2], [0], [0]>} : vector<2x32x4xf32>, vector<2x4x16xf32>, vector<2x32x16xf32> -> vector<2x32x16xf32>
    %7 = vector.extract_strided_slice %6 {offsets = [0, 8, 0], sizes = [2, 8, 16], strides = [1, 1, 1]} : vector<2x32x16xf32> to vector<2x8x16xf32>
    %8 = vector.extract_strided_slice %6 {offsets = [0, 0, 0], sizes = [2, 8, 16], strides = [1, 1, 1]} : vector<2x32x16xf32> to vector<2x8x16xf32>
    %cst_6 = arith.constant 0.000000e+00 : f32
    %9 = vector.broadcast %cst_6 : f32 to vector<2x8x1xf32>
    %10 = vector.extract_strided_slice %8 {offsets = [0, 0, 0], sizes = [2, 8, 15], strides = [1, 1, 1]} : vector<2x8x16xf32> to vector<2x8x15xf32>
    %11 = tpu.concatenate %9, %10 in 2 : vector<2x8x1xf32>, vector<2x8x15xf32> -> vector<2x8x16xf32>
    %12 = arith.addf %7, %11 : vector<2x8x16xf32>
    %13 = vector.extract_strided_slice %6 {offsets = [0, 16, 0], sizes = [2, 8, 16], strides = [1, 1, 1]} : vector<2x32x16xf32> to vector<2x8x16xf32>
    %cst_7 = arith.constant 0.000000e+00 : f32
    %14 = vector.broadcast %cst_7 : f32 to vector<2x8x1xf32>
    %15 = vector.extract_strided_slice %13 {offsets = [0, 0, 1], sizes = [2, 8, 15], strides = [1, 1, 1]} : vector<2x8x16xf32> to vector<2x8x15xf32>
    %16 = tpu.concatenate %15, %14 in 2 : vector<2x8x15xf32>, vector<2x8x1xf32> -> vector<2x8x16xf32>
    %17 = arith.addf %12, %16 : vector<2x8x16xf32>
    %18 = vector.extract_strided_slice %6 {offsets = [0, 24, 0], sizes = [2, 8, 16], strides = [1, 1, 1]} : vector<2x32x16xf32> to vector<2x8x16xf32>
    %cst_8 = arith.constant dense<0.000000e+00> : vector<2x8xf32>
    %19 = vector.multi_reduction <add>, %17, %cst_8 [2] : vector<2x8x16xf32> to vector<2x8xf32>
    %20 = vector.shape_cast %19 : vector<2x8xf32> to vector<2x8x1xf32>
    %cst_9 = arith.constant dense<0.000000e+00> : vector<8x1xf32>
    %21 = vector.multi_reduction <add>, %20, %cst_9 [0] : vector<2x8x1xf32> to vector<8x1xf32>
    %22 = vector.shape_cast %21 : vector<8x1xf32> to vector<1x8x1xf32>
    %23 = arith.mulf %17, %17 : vector<2x8x16xf32>
    %cst_10 = arith.constant dense<0.000000e+00> : vector<2x8xf32>
    %24 = vector.multi_reduction <add>, %23, %cst_10 [2] : vector<2x8x16xf32> to vector<2x8xf32>
    %25 = vector.shape_cast %24 : vector<2x8xf32> to vector<2x8x1xf32>
    %cst_11 = arith.constant dense<0.000000e+00> : vector<8x1xf32>
    %26 = vector.multi_reduction <add>, %25, %cst_11 [0] : vector<2x8x1xf32> to vector<8x1xf32>
    %27 = vector.shape_cast %26 : vector<8x1xf32> to vector<1x8x1xf32>
    %cst_12 = arith.constant 3.125000e-02 : f32
    %28 = vector.broadcast %cst_12 : f32 to vector<1x8x1xf32>
    %29 = arith.mulf %22, %28 : vector<1x8x1xf32>
    %cst_13 = arith.constant 3.125000e-02 : f32
    %30 = vector.broadcast %cst_13 : f32 to vector<1x8x1xf32>
    %31 = arith.mulf %27, %30 : vector<1x8x1xf32>
    %32 = arith.mulf %29, %29 : vector<1x8x1xf32>
    %33 = arith.subf %31, %32 : vector<1x8x1xf32>
    %c0_14 = arith.constant 0 : index
    %c0_15 = arith.constant 0 : index
    %c0_16 = arith.constant 0 : index
    %34 = vector.load %arg3[%c0_14, %c0_15, %c0_16] : memref<1x8x1xf32, #tpu.memory_space<vmem>>, vector<1x8x1xf32>
    %cst_17 = arith.constant 9.99999974E-6 : f32
    %35 = vector.broadcast %cst_17 : f32 to vector<1x8x1xf32>
    %36 = arith.addf %33, %35 : vector<1x8x1xf32>
    %37 = math.rsqrt %36 : vector<1x8x1xf32>
    %38 = arith.mulf %34, %37 : vector<1x8x1xf32>
    %c0_18 = arith.constant 0 : index
    %c0_19 = arith.constant 0 : index
    %c0_20 = arith.constant 0 : index
    %39 = vector.load %arg4[%c0_18, %c0_19, %c0_20] : memref<1x8x1xf32, #tpu.memory_space<vmem>>, vector<1x8x1xf32>
    %40 = arith.mulf %29, %38 : vector<1x8x1xf32>
    %41 = arith.subf %39, %40 : vector<1x8x1xf32>
    %42 = vector.broadcast %38 : vector<1x8x1xf32> to vector<2x8x16xf32>
    %43 = arith.mulf %17, %42 : vector<2x8x16xf32>
    %44 = vector.broadcast %41 : vector<1x8x1xf32> to vector<2x8x16xf32>
    %45 = arith.addf %43, %44 : vector<2x8x16xf32>
    %cst_21 = arith.constant 0.000000e+00 : f32
    %46 = vector.broadcast %cst_21 : f32 to vector<2x8x16xf32>
    %47 = arith.maximumf %45, %46 : vector<2x8x16xf32>
    %48 = vector.shape_cast %2 : vector<24x8xf32> to vector<1x24x8xf32>
    %49 = vector.shape_cast %48 : vector<1x24x8xf32> to vector<1x24x8xf32>
    %50 = vector.broadcast %49 : vector<1x24x8xf32> to vector<2x24x8xf32>
    %cst_22 = arith.constant dense<0.000000e+00> : vector<2x24x16xf32>
    %51 = tpu.matmul %50, %47, %cst_22 {dimension_numbers = #tpu.dot_dimension_numbers<[2], [1], [1], [2], [0, 0, 0, 1, 1, 2], [0], [0]>} : vector<2x24x8xf32>, vector<2x8x16xf32>, vector<2x24x16xf32> -> vector<2x24x16xf32>
    %52 = vector.extract_strided_slice %51 {offsets = [0, 8, 0], sizes = [2, 8, 16], strides = [1, 1, 1]} : vector<2x24x16xf32> to vector<2x8x16xf32>
    %53 = vector.extract_strided_slice %51 {offsets = [0, 0, 0], sizes = [2, 8, 16], strides = [1, 1, 1]} : vector<2x24x16xf32> to vector<2x8x16xf32>
    %cst_23 = arith.constant 0.000000e+00 : f32
    %54 = vector.broadcast %cst_23 : f32 to vector<2x8x1xf32>
    %55 = vector.extract_strided_slice %53 {offsets = [0, 0, 0], sizes = [2, 8, 15], strides = [1, 1, 1]} : vector<2x8x16xf32> to vector<2x8x15xf32>
    %56 = tpu.concatenate %54, %55 in 2 : vector<2x8x1xf32>, vector<2x8x15xf32> -> vector<2x8x16xf32>
    %57 = arith.addf %52, %56 : vector<2x8x16xf32>
    %58 = vector.extract_strided_slice %51 {offsets = [0, 16, 0], sizes = [2, 8, 16], strides = [1, 1, 1]} : vector<2x24x16xf32> to vector<2x8x16xf32>
    %cst_24 = arith.constant 0.000000e+00 : f32
    %59 = vector.broadcast %cst_24 : f32 to vector<2x8x1xf32>
    %60 = vector.extract_strided_slice %58 {offsets = [0, 0, 1], sizes = [2, 8, 15], strides = [1, 1, 1]} : vector<2x8x16xf32> to vector<2x8x15xf32>
    %61 = tpu.concatenate %60, %59 in 2 : vector<2x8x15xf32>, vector<2x8x1xf32> -> vector<2x8x16xf32>
    %62 = arith.addf %57, %61 : vector<2x8x16xf32>
    %cst_25 = arith.constant dense<0.000000e+00> : vector<2x8xf32>
    %63 = vector.multi_reduction <add>, %62, %cst_25 [2] : vector<2x8x16xf32> to vector<2x8xf32>
    %64 = vector.shape_cast %63 : vector<2x8xf32> to vector<2x8x1xf32>
    %cst_26 = arith.constant dense<0.000000e+00> : vector<8x1xf32>
    %65 = vector.multi_reduction <add>, %64, %cst_26 [0] : vector<2x8x1xf32> to vector<8x1xf32>
    %66 = vector.shape_cast %65 : vector<8x1xf32> to vector<1x8x1xf32>
    %67 = arith.mulf %62, %62 : vector<2x8x16xf32>
    %cst_27 = arith.constant dense<0.000000e+00> : vector<2x8xf32>
    %68 = vector.multi_reduction <add>, %67, %cst_27 [2] : vector<2x8x16xf32> to vector<2x8xf32>
    %69 = vector.shape_cast %68 : vector<2x8xf32> to vector<2x8x1xf32>
    %cst_28 = arith.constant dense<0.000000e+00> : vector<8x1xf32>
    %70 = vector.multi_reduction <add>, %69, %cst_28 [0] : vector<2x8x1xf32> to vector<8x1xf32>
    %71 = vector.shape_cast %70 : vector<8x1xf32> to vector<1x8x1xf32>
    %cst_29 = arith.constant 3.125000e-02 : f32
    %72 = vector.broadcast %cst_29 : f32 to vector<1x8x1xf32>
    %73 = arith.mulf %66, %72 : vector<1x8x1xf32>
    %cst_30 = arith.constant 3.125000e-02 : f32
    %74 = vector.broadcast %cst_30 : f32 to vector<1x8x1xf32>
    %75 = arith.mulf %71, %74 : vector<1x8x1xf32>
    %76 = arith.mulf %73, %73 : vector<1x8x1xf32>
    %77 = arith.subf %75, %76 : vector<1x8x1xf32>
    %c0_31 = arith.constant 0 : index
    %c0_32 = arith.constant 0 : index
    %c0_33 = arith.constant 0 : index
    %78 = vector.load %arg5[%c0_31, %c0_32, %c0_33] : memref<1x8x1xf32, #tpu.memory_space<vmem>>, vector<1x8x1xf32>
    %cst_34 = arith.constant 9.99999974E-6 : f32
    %79 = vector.broadcast %cst_34 : f32 to vector<1x8x1xf32>
    %80 = arith.addf %77, %79 : vector<1x8x1xf32>
    %81 = math.rsqrt %80 : vector<1x8x1xf32>
    %82 = arith.mulf %78, %81 : vector<1x8x1xf32>
    %c0_35 = arith.constant 0 : index
    %c0_36 = arith.constant 0 : index
    %c0_37 = arith.constant 0 : index
    %83 = vector.load %arg6[%c0_35, %c0_36, %c0_37] : memref<1x8x1xf32, #tpu.memory_space<vmem>>, vector<1x8x1xf32>
    %84 = arith.mulf %73, %82 : vector<1x8x1xf32>
    %85 = arith.subf %83, %84 : vector<1x8x1xf32>
    %86 = vector.broadcast %82 : vector<1x8x1xf32> to vector<2x8x16xf32>
    %87 = arith.mulf %62, %86 : vector<2x8x16xf32>
    %88 = vector.broadcast %85 : vector<1x8x1xf32> to vector<2x8x16xf32>
    %89 = arith.addf %87, %88 : vector<2x8x16xf32>
    %cst_38 = arith.constant dense<0.000000e+00> : vector<2x8xf32>
    %90 = vector.multi_reduction <add>, %18, %cst_38 [2] : vector<2x8x16xf32> to vector<2x8xf32>
    %91 = vector.shape_cast %90 : vector<2x8xf32> to vector<2x8x1xf32>
    %cst_39 = arith.constant dense<0.000000e+00> : vector<8x1xf32>
    %92 = vector.multi_reduction <add>, %91, %cst_39 [0] : vector<2x8x1xf32> to vector<8x1xf32>
    %93 = vector.shape_cast %92 : vector<8x1xf32> to vector<1x8x1xf32>
    %94 = arith.mulf %18, %18 : vector<2x8x16xf32>
    %cst_40 = arith.constant dense<0.000000e+00> : vector<2x8xf32>
    %95 = vector.multi_reduction <add>, %94, %cst_40 [2] : vector<2x8x16xf32> to vector<2x8xf32>
    %96 = vector.shape_cast %95 : vector<2x8xf32> to vector<2x8x1xf32>
    %cst_41 = arith.constant dense<0.000000e+00> : vector<8x1xf32>
    %97 = vector.multi_reduction <add>, %96, %cst_41 [0] : vector<2x8x1xf32> to vector<8x1xf32>
    %98 = vector.shape_cast %97 : vector<8x1xf32> to vector<1x8x1xf32>
    %cst_42 = arith.constant 3.125000e-02 : f32
    %99 = vector.broadcast %cst_42 : f32 to vector<1x8x1xf32>
    %100 = arith.mulf %93, %99 : vector<1x8x1xf32>
    %cst_43 = arith.constant 3.125000e-02 : f32
    %101 = vector.broadcast %cst_43 : f32 to vector<1x8x1xf32>
    %102 = arith.mulf %98, %101 : vector<1x8x1xf32>
    %103 = arith.mulf %100, %100 : vector<1x8x1xf32>
    %104 = arith.subf %102, %103 : vector<1x8x1xf32>
    %c0_44 = arith.constant 0 : index
    %c0_45 = arith.constant 0 : index
    %c0_46 = arith.constant 0 : index
    %105 = vector.load %arg7[%c0_44, %c0_45, %c0_46] : memref<1x8x1xf32, #tpu.memory_space<vmem>>, vector<1x8x1xf32>
    %cst_47 = arith.constant 9.99999974E-6 : f32
    %106 = vector.broadcast %cst_47 : f32 to vector<1x8x1xf32>
    %107 = arith.addf %104, %106 : vector<1x8x1xf32>
    %108 = math.rsqrt %107 : vector<1x8x1xf32>
    %109 = arith.mulf %105, %108 : vector<1x8x1xf32>
    %c0_48 = arith.constant 0 : index
    %c0_49 = arith.constant 0 : index
    %c0_50 = arith.constant 0 : index
    %110 = vector.load %arg8[%c0_48, %c0_49, %c0_50] : memref<1x8x1xf32, #tpu.memory_space<vmem>>, vector<1x8x1xf32>
    %111 = arith.mulf %100, %109 : vector<1x8x1xf32>
    %112 = arith.subf %110, %111 : vector<1x8x1xf32>
    %113 = vector.broadcast %109 : vector<1x8x1xf32> to vector<2x8x16xf32>
    %114 = arith.mulf %18, %113 : vector<2x8x16xf32>
    %115 = vector.broadcast %112 : vector<1x8x1xf32> to vector<2x8x16xf32>
    %116 = arith.addf %114, %115 : vector<2x8x16xf32>
    %117 = arith.addf %89, %116 : vector<2x8x16xf32>
    %cst_51 = arith.constant 0.000000e+00 : f32
    %118 = vector.broadcast %cst_51 : f32 to vector<2x8x16xf32>
    %119 = arith.maximumf %117, %118 : vector<2x8x16xf32>
    %c0_52 = arith.constant 0 : index
    %c0_53 = arith.constant 0 : index
    %c0_54 = arith.constant 0 : index
    %120 = vector.load %arg9[%c0_52, %c0_53, %c0_54] : memref<2x8x16xf32, #tpu.memory_space<vmem>>, vector<2x8x16xf32>
    tpu.vector_store %arg9[%c0_52, %c0_53, %c0_54], %119 {strides = array<i32>} : memref<2x8x16xf32, #tpu.memory_space<vmem>>, vector<2x8x16xf32>,
    return
  }
}

</mosaic_0001>

<bundles_post_ra>
// kernel: tpu_custom_call.1
= control target key start
LH: loop header
LB: loop body
LE: loop exit
PB: predicated region body
PF: predicated region fallthrough
CT: control target
= control target key end

     0   :  { %vm55_vm0 = vcmask 1043456   ;;  %vm42_vm1 = vcmask 31744   ;;  %s889_s0 = inlined_call_operand.vmem [shape: f32[2,4,16], index: 0, kind: input, shape index: {}]   ;;  %s890_s1 = inlined_call_operand.vmem [shape: f32[32,4], index: 1, kind: input, shape index: {}]   ;;  %s891_s2 = inlined_call_operand.vmem [shape: f32[24,8], index: 2, kind: input, shape index: {}]   ;;  %s892_s3 = inlined_call_operand.vmem [shape: f32[1,8,1], index: 3, kind: input, shape index: {}]   ;;  %s893_s4 = inlined_call_operand.vmem [shape: f32[1,8,1], index: 4, kind: input, shape index: {}]   ;;  %s894_s5 = inlined_call_operand.vmem [shape: f32[1,8,1], index: 5, kind: input, shape index: {}]   ;;  %s895_s6 = inlined_call_operand.vmem [shape: f32[1,8,1], index: 6, kind: input, shape index: {}]   ;;  %s896_s7 = inlined_call_operand.vmem [shape: f32[1,8,1], index: 7, kind: input, shape index: {}]   ;;  %s897_s8 = inlined_call_operand.vmem [shape: f32[1,8,1], index: 8, kind: input, shape index: {}]   ;;  %s898_s9 = inlined_call_operand.hbm [shape: f32[2,8,16], index: 9, kind: output, shape index: {}]  }
   0x1   :  { %v33_v0 = vld [vmem:[%s889_s0] sm:$0xf]  ;;  %v36_v2 = vld [vmem:[%s890_s1 + $0x8] sm:$0xff]  ;;  %v34_v3 = vld [vmem:[%s889_s0 + $0x4] sm:$0xf] }
   0x2   :  { %v35_v1 = vld [vmem:[%s890_s1] sm:$0xff]  ;;  %634 = vmatprep.subr.msk.mxu0 %vm55_vm0, %v33_v0  ;;  %v37_v4 = vld [vmem:[%s890_s1 + $0x10] sm:$0xff]  ;;  %642 = vmatprep.subr.msk.mxu1 %vm55_vm0, %v34_v3 }
   0x3   :  { %636 = vmatprep.mubr.msk.f32.mxu0 %vm42_vm1, %v35_v1  ;;  %635 = vmatpush3.msk.msra.mxu0 %vm55_vm0, %v33_v0 }
   0x4   :  { %14 = vsyncpa [#allocation3], 0  ;;  %637 = vmatmul.mubr.msk.f32.vlgmr.msra.gmra.mrb[0].mxu0 %vm42_vm1, %v36_v2  ;;  %643 = vmatpush3.msk.msra.mxu1 %vm55_vm0, %v34_v3  ;;  %v38_v5 = vld [vmem:[%s890_s1 + $0x18] sm:$0xff]  ;;  %s712_s0 = smov 1   ;;  %s713_s1 = smov 127   ;;  %vm240_vm2 = vcmask 7168  }
   0x5   :  { %639 = vmatprep.mubr.msk.f32.mxu0 %vm42_vm1, %v37_v4  ;;  %644 = vmatprep.mubr.msk.f32.mxu1 %vm42_vm1, %v35_v1  ;;  %vm253_vm3 = vcmask 121856   ;;  %vm258_vm4 = vcmask 130048   ;;  %v714_v32 = vmov 0   ;;  %v279_v44 = vld [vmem:[%s892_s3] sm:$0xff]  ;;  %v715_v50 = vmov 0.0   ;;  %v40_v60 = vld [vmem:[%s891_s2 + $0x8] sm:$0xff] }
   0x6   :  { %645 = vmatmul.mubr.msk.f32.vlgmr.msra.gmra.mrb[0].mxu1 %vm42_vm1, %v36_v2  ;;  %680 = vset.pattern.permute.xlu1 %v714_v32  ;;  %v283_v47 = vld [vmem:[%s893_s4] sm:$0xff]  ;;  %vm716_vm5 = vmmov 0   ;;  %vm302_vm6 = vcmask 64512   ;;  %v41_v61 = vld [vmem:[%s891_s2 + $0x10] sm:$0xff] }
   0x7   :  { %647 = vmatprep.mubr.msk.f32.mxu1 %vm42_vm1, %v37_v4  ;;  %681 = vset.pattern.permute.xlu0 %v714_v32  ;;  %v39_v59 = vld [vmem:[%s891_s2] sm:$0xff] }
   0x8   :  { %640 = vmatmul.mubr.msk.f32.gmra.mrb[2].mxu0 %vm42_vm1, %v38_v5  ;;  %650 = vmatprep.subr.mxu0 %v715_v50 }
   0x9   :  { %661 = vmatprep.subr.mxu1 %v715_v50  ;;  %652 = vmatprep.mubr.msk.f32.mxu0 %vm716_vm5, %v715_v50 }
   0xa   :  { %648 = vmatmul.mubr.msk.f32.gmra.mrb[2].mxu1 %vm42_vm1, %v38_v5 }
   0xb   :  { %663 = vmatprep.mubr.msk.f32.mxu1 %vm716_vm5, %v715_v50 }
  0xd7   :  { %v638_v6 = vpop.f32.mrb[0].mxu0 }
  0xd8   :  { %v125_v7 = vpop.f32.mrb[1].mxu0 }
  0xd9   :  { %234 = vrot.lane.b32.xlu0 %v125_v7, %s712_s0  ;;  %v646_v8 = vpop.f32.mrb[0].mxu1 }
  0xda   :  { %v213_v9 = vpop.f32.mrb[1].mxu1 }
  0xdb   :  { %v797_v10 = vpop.f32.mrb[2].mxu0 }
  0xdc   :  { %v135_v11 = vpop.f32.mrb[3].mxu0 }
  0xdd   :  { %236 = vrot.lane.b32.xlu0 %v213_v9, %s712_s0  ;;  %247 = vrot.lane.b32.xlu1 %v135_v11, %s713_s1  ;;  %v801_v12 = vpop.f32.mrb[2].mxu1  ;;  %v537_v11 = vsel %vm258_vm4, %v797_v10, 0.0 }
  0xde   :  { %v223_v13 = vpop.f32.mrb[3].mxu1 }
  0xe1   :  { %249 = vrot.lane.b32.xlu1 %v223_v13, %s713_s1  ;;  %v540_v13 = vsel %vm258_vm4, %v801_v12, 0.0 }
 0x14b   :  { %v235_v14 = vpop.permute.xlu0 %234 }
 0x14c   :  { %v241_v15 = vsel %vm240_vm2, 0.0, %v235_v14 }
 0x14d   :  { %v243_v16 = vadd.f32 %v638_v6, %v241_v15 }
 0x14f   :  { %v237_v17 = vpop.permute.xlu0 %236  ;;  %v248_v18 = vpop.permute.xlu1 %247 }
 0x150   :  { %v242_v19 = vsel %vm240_vm2, 0.0, %v237_v17  ;;  %v254_v20 = vsel %vm253_vm3, %v248_v18, 0.0 }
 0x151   :  { %v256_v21 = vadd.f32 %v254_v20, %v243_v16  ;;  %v244_v22 = vadd.f32 %v646_v8, %v242_v19 }
 0x153   :  { %v250_v23 = vpop.permute.xlu1 %249  ;;  %v259_v24 = vsel %vm258_vm4, %v256_v21, 0.0  ;;  %v266_v25 = vmul.f32 %v256_v21, %v256_v21 }
 0x154   :  { %v255_v26 = vsel %vm253_vm3, %v250_v23, 0.0  ;;  %260 = vadd.xlane.f32.xlu0 %v259_v24 }
 0x155   :  { %v257_v27 = vadd.f32 %v255_v26, %v244_v22  ;;  %v268_v28 = vsel %vm258_vm4, %v266_v25, 0.0 }
 0x157   :  { %v262_v29 = vsel %vm258_vm4, %v257_v27, 0.0  ;;  %v267_v30 = vmul.f32 %v257_v27, %v257_v27 }
 0x158   :  { %269 = vadd.xlane.f32.xlu0 %v268_v28  ;;  %263 = vadd.xlane.f32.xlu1 %v262_v29 }
 0x159   :  { %v271_v31 = vsel %vm258_vm4, %v267_v30, 0.0  ;;  %v544_v30 = vmul.f32 %v797_v10, %v797_v10 }
 0x15b   :  { %v546_v32 = vsel %vm258_vm4, %v544_v30, 0.0 }
 0x15c   :  { %272 = vadd.xlane.f32.xlu0 %v271_v31 }
 0x1e1   :  { %v261_v33 = vpop.xlane.xlu0 %260 }
 0x1e5   :  { %v270_v34 = vpop.xlane.xlu0 %269  ;;  %v264_v35 = vpop.xlane.xlu1 %263 }
 0x1e6   :  { %v265_v36 = vadd.f32 %v264_v35, %v261_v33 }
 0x1e8   :  { %v275_v37 = vmul.f32 0.03125, %v265_v36 }
 0x1e9   :  { %v273_v38 = vpop.xlane.xlu0 %272 }
 0x1ea   :  { %v274_v39 = vadd.f32 %v273_v38, %v270_v34  ;;  %v277_v40 = vmul.f32 %v275_v37, %v275_v37  ;;  %v545_v34 = vmul.f32 %v801_v12, %v801_v12 }
 0x1ec   :  { %v276_v41 = vmul.f32 0.03125, %v274_v39  ;;  %v549_v35 = vsel %vm258_vm4, %v545_v34, 0.0 }
 0x1ee   :  { %v278_v42 = vsub.f32 %v276_v41, %v277_v40 }
 0x1f0   :  { %v280_v43 = vadd.f32 1e-05, %v278_v42 }
 0x1f2   :  { %682 = vrsqrt.f32 %v280_v43 }
 0x1fc   :  { %v683_v45 = vpop.eup %682 }
 0x1fd   :  { %v282_v46 = vmul.f32 %v683_v45, %v279_v44 }
 0x1ff   :  { %288 = vperm.xlu1 %680, %v282_v46   ;;  %v284_v48 = vmul.f32 %v282_v46, %v275_v37 }
 0x201   :  { %v285_v49 = vsub.f32 %v283_v47, %v284_v48 }
 0x203   :  { %295 = vperm.xlu0 %681, %v285_v49  }
 0x27e   :  { %v289_v51 = vpop.permute.xlu1 %288 }
 0x27f   :  { %v291_v52 = vmul.f32 %v289_v51, %v256_v21  ;;  %v292_v53 = vmul.f32 %v289_v51, %v257_v27 }
 0x282   :  { %v296_v54 = vpop.permute.xlu0 %295 }
 0x283   :  { %v298_v55 = vadd.f32 %v296_v54, %v291_v52  ;;  %v299_v56 = vadd.f32 %v296_v54, %v292_v53 }
 0x285   :  { %v300_v57 = vmax.f32 %v298_v55, 0.0  ;;  %v301_v58 = vmax.f32 %v299_v56, 0.0 }
 0x287   :  { %651 = vmatpush3.msra.mxu0 %v300_v57  ;;  %662 = vmatpush3.msra.mxu1 %v301_v58  ;;  %v516_v58 = vld [vmem:[%s894_s5] sm:$0xff]  ;;  %s717_s5 = smov [#allocation2]  }
 0x288   :  { %653 = vmatmul.mubr.msk.f32.vlgmr.msra.gmra.mrb[4].mxu0 %vm302_vm6, %v39_v59  ;;  %664 = vmatmul.mubr.msk.f32.vlgmr.msra.gmra.mrb[4].mxu1 %vm302_vm6, %v39_v59 }
 0x289   :  { %655 = vmatprep.mubr.msk.f32.mxu0 %vm716_vm5, %v715_v50  ;;  %666 = vmatprep.mubr.msk.f32.mxu1 %vm716_vm5, %v715_v50 }
 0x28c   :  { %656 = vmatmul.mubr.msk.f32.gmra.mrb[6].mxu0 %vm302_vm6, %v40_v60  ;;  %667 = vmatmul.mubr.msk.f32.gmra.mrb[6].mxu1 %vm302_vm6, %v40_v60 }
 0x28d   :  { %658 = vmatprep.mubr.msk.f32.mxu0 %vm716_vm5, %v715_v50  ;;  %669 = vmatprep.mubr.msk.f32.mxu1 %vm716_vm5, %v715_v50 }
 0x290   :  { %659 = vmatmul.mubr.msk.f32.gmra.mrb[8].mxu0 %vm302_vm6, %v41_v61  ;;  %670 = vmatmul.mubr.msk.f32.gmra.mrb[8].mxu1 %vm302_vm6, %v41_v61  ;;  %v520_v61 = vld [vmem:[%s895_s6] sm:$0xff]  ;;  %s589_s6 = sshll.u32 %s717_s5, 4  ;;  %s590_s6 = int_to_ptr.vmem [resolvable:$true] %s589_s6 }
 0x291   :  { %p693_p1 = scmp.lt.s32.totalorder %s590_s6, %s590_s6 }
 0x35b   :  { %v378_v62 = vpop.f32.mrb[4].mxu0  ;;  %v458_v63 = vpop.f32.mrb[4].mxu1 }
 0x35c   :  { %474 = vrot.lane.b32.xlu1 %v378_v62, %s712_s0  ;;  %v654_v0 = vpop.f32.mrb[5].mxu0  ;;  %v665_v1 = vpop.f32.mrb[5].mxu1  ;;  %v557_v62 = vld [vmem:[%s896_s7] sm:$0xff]  ;;  %s688_s7 = scalar_lea.vmem %s590_s6, 256 }
 0x35d   :  { %p689_p0 = scmp.ne.s32.totalorder %s590_s6, %s688_s7  ;;  %p694_p2 = scmp.lt.s32.totalorder %s688_s7, %s688_s7 }
 0x35f   :  { %v383_v2 = vpop.f32.mrb[6].mxu0  ;;  %v463_v3 = vpop.f32.mrb[6].mxu1  ;;  %p695_p3 = por %p694_p2, %p693_p1 }
 0x360   :  { %476 = vrot.lane.b32.xlu1 %v458_v63, %s712_s0  ;;  %v657_v4 = vpop.f32.mrb[7].mxu0  ;;  %v668_v5 = vpop.f32.mrb[7].mxu1 }
 0x361   :  { %p696_p4 = pnand %p695_p3, %p689_p0 }
 0x363   :  { %v388_v6 = vpop.f32.mrb[8].mxu0  ;;  %v468_v7 = vpop.f32.mrb[8].mxu1 }
 0x364   :  { %486 = vrot.lane.b32.xlu1 %v388_v6, %s713_s1  ;;  %v660_v8 = vpop.f32.mrb[9].mxu0  ;;  %v671_v9 = vpop.f32.mrb[9].mxu1 }
 0x368   :  { %488 = vrot.lane.b32.xlu1 %v468_v7, %s713_s1 }
 0x38c   :  { %538 = vadd.xlane.f32.xlu1 %v537_v11 }
 0x390   :  { %541 = vadd.xlane.f32.xlu1 %v540_v13 }
 0x3ce   :  { %v475_v14 = vpop.permute.xlu1 %474 }
 0x3cf   :  { %v480_v16 = vsel %vm240_vm2, 0.0, %v475_v14 }
 0x3d0   :  { %v482_v17 = vadd.f32 %v480_v16, %v383_v2 }
 0x3d2   :  { %v477_v15 = vpop.permute.xlu1 %476 }
 0x3d3   :  { %v481_v19 = vsel %vm240_vm2, 0.0, %v477_v15 }
 0x3d4   :  { %v483_v22 = vadd.f32 %v481_v19, %v463_v3  ;;  %v561_v3 = vld [vmem:[%s897_s8] sm:$0xff] }
 0x3d6   :  { %v487_v18 = vpop.permute.xlu1 %486 }
 0x3d7   :  { %v492_v20 = vsel %vm253_vm3, %v487_v18, 0.0 }
 0x3d8   :  { %v844_v21 = vadd.f32 %v492_v20, %v482_v17 }
 0x3da   :  { %v489_v23 = vpop.permute.xlu1 %488  ;;  %v496_v24 = vsel %vm258_vm4, %v844_v21, 0.0  ;;  %v503_v25 = vmul.f32 %v844_v21, %v844_v21 }
 0x3db   :  { %v493_v26 = vsel %vm253_vm3, %v489_v23, 0.0  ;;  %497 = vadd.xlane.f32.xlu1 %v496_v24 }
 0x3dc   :  { %v495_v27 = vadd.f32 %v493_v26, %v483_v22  ;;  %v505_v28 = vsel %vm258_vm4, %v503_v25, 0.0 }
 0x3de   :  { %v499_v29 = vsel %vm258_vm4, %v495_v27, 0.0  ;;  %v504_v31 = vmul.f32 %v495_v27, %v495_v27 }
 0x3df   :  { %506 = vadd.xlane.f32.xlu1 %v505_v28  ;;  %500 = vadd.xlane.f32.xlu0 %v499_v29 }
 0x3e0   :  { %v508_v33 = vsel %vm258_vm4, %v504_v31, 0.0 }
 0x3e3   :  { %547 = vadd.xlane.f32.xlu1 %v546_v32  ;;  %509 = vadd.xlane.f32.xlu0 %v508_v33 }
 0x3e7   :  { %550 = vadd.xlane.f32.xlu0 %v549_v35 }
 0x419   :  { %v539_v36 = vpop.xlane.xlu1 %538 }
 0x41d   :  { %v542_v37 = vpop.xlane.xlu1 %541 }
 0x41e   :  { %v543_v42 = vadd.f32 %v542_v37, %v539_v36 }
 0x420   :  { %v553_v46 = vmul.f32 0.03125, %v543_v42 }
 0x422   :  { %v555_v53 = vmul.f32 %v553_v46, %v553_v46 }
 0x468   :  { %v498_v38 = vpop.xlane.xlu1 %497 }
 0x46c   :  { %v501_v39 = vpop.xlane.xlu0 %500  ;;  %v507_v41 = vpop.xlane.xlu1 %506 }
 0x46d   :  { %v502_v40 = vadd.f32 %v501_v39, %v498_v38 }
 0x46f   :  { %v512_v43 = vmul.f32 0.03125, %v502_v40 }
 0x470   :  { %v510_v44 = vpop.xlane.xlu0 %509  ;;  %v548_v49 = vpop.xlane.xlu1 %547 }
 0x471   :  { %v511_v45 = vadd.f32 %v510_v44, %v507_v41  ;;  %v514_v47 = vmul.f32 %v512_v43, %v512_v43 }
 0x473   :  { %v513_v48 = vmul.f32 0.03125, %v511_v45 }
 0x474   :  { %v551_v50 = vpop.xlane.xlu0 %550 }
 0x475   :  { %v515_v51 = vsub.f32 %v513_v48, %v514_v47  ;;  %v552_v52 = vadd.f32 %v551_v50, %v548_v49 }
 0x477   :  { %v517_v54 = vadd.f32 1e-05, %v515_v51  ;;  %v554_v55 = vmul.f32 0.03125, %v552_v52 }
 0x479   :  { %684 = vrsqrt.f32 %v517_v54  ;;  %v556_v56 = vsub.f32 %v554_v55, %v555_v53 }
 0x47b   :  { %v558_v57 = vadd.f32 1e-05, %v556_v56 }
 0x47d   :  { %686 = vrsqrt.f32 %v558_v57 }
 0x483   :  { %v685_v59 = vpop.eup %684 }
 0x484   :  { %v519_v60 = vmul.f32 %v685_v59, %v516_v58 }
 0x486   :  { %525 = vperm.xlu1 %680, %v519_v60   ;;  %v521_v63 = vmul.f32 %v519_v60, %v512_v43 }
 0x487   :  { %v687_v0 = vpop.eup %686 }
 0x488   :  { %v522_v1 = vsub.f32 %v520_v61, %v521_v63  ;;  %v560_v2 = vmul.f32 %v687_v0, %v557_v62 }
 0x48a   :  { %532 = vperm.xlu1 %680, %v522_v1   ;;  %566 = vperm.xlu0 %681, %v560_v2   ;;  %v562_v4 = vmul.f32 %v560_v2, %v553_v46 }
 0x48c   :  { %v563_v5 = vsub.f32 %v561_v3, %v562_v4 }
 0x48e   :  { %573 = vperm.xlu1 %680, %v563_v5  }
 0x505   :  { %v526_v6 = vpop.permute.xlu1 %525 }
 0x506   :  { %v528_v9 = vmul.f32 %v526_v6, %v844_v21  ;;  %v529_v11 = vmul.f32 %v526_v6, %v495_v27 }
 0x509   :  { %v567_v7 = vpop.permute.xlu0 %566  ;;  %v533_v8 = vpop.permute.xlu1 %532 }
 0x50a   :  { %v569_v13 = vmul.f32 %v797_v10, %v567_v7  ;;  %v570_v14 = vmul.f32 %v801_v12, %v567_v7  ;;  %v535_v16 = vadd.f32 %v533_v8, %v528_v9  ;;  %v536_v17 = vadd.f32 %v533_v8, %v529_v11 }
 0x50d   :  { %v574_v15 = vpop.permute.xlu1 %573 }
 0x50e   :  { %v576_v18 = vadd.f32 %v574_v15, %v569_v13  ;;  %v577_v19 = vadd.f32 %v574_v15, %v570_v14 }
 0x510   :  { %v578_v20 = vadd.f32 %v576_v18, %v535_v16  ;;  %v579_v22 = vadd.f32 %v577_v19, %v536_v17 }
 0x512   :  { %v580_v23 = vmax.f32 %v578_v20, 0.0  ;;  %v581_v24 = vmax.f32 %v579_v22, 0.0 }
 0x514   :  { %582 = vst.msk [vmem:[#allocation2] sm:$0xff] %vm258_vm4, %v580_v23  ;;  %583 = vst.msk [vmem:[#allocation2 + $0x8] sm:$0xff] %vm258_vm4, %v581_v24 }
 0x515   :  { %699 = shalt.err (!%p696_p4)
}
 0x516   :  { %s700_s16 = scalar_lea.hbm %s898_s9, 256 }
 0x517   :  { %p701_p5 = scmp.ne.s32.totalorder %s898_s9, %s700_s16  ;;  %p704_p6 = scmp.lt.u32.totalorder %s700_s16, %s898_s9 }
 0x519   :  { %p706_p7 = pnand %p704_p6, %p701_p5 }
 0x51b   :  { %709 = shalt.err (!%p706_p7)
}
 0x51c   :  { %s718_s0 = smov 128   ;;  %s719_s1 = smov 8  }
 0x51d   :  { %595 = dma.vmem_to_hbm [thread:$0]  %s590_s6, 256, %s898_s9, [#allocation3], %s718_s0, %s718_s0, %s719_s1  }
 0x51e   :  { %710 = dma.done.wait [#allocation3], 256  }
 0x51f   :  { %711 = vsyncadd [#allocation3], 4294967040 }
 0x520   :  { %599 = vsyncpa [#allocation3], 1 }

</bundles_post_ra>
